<compile_context>
chip_gen: v5e
topology: v5e:2x2
jax: 0.10.0
libtpu: 0.0.40
codegen_flags: <defaults>
</compile_context>

<pallas_src>
import jax
import jax.numpy as jnp
from jax.experimental import pallas as pl
from jax.experimental.pallas import tpu as pltpu


def _linear_relu_kernel(x_ref, w_ref, b_ref, o_ref):
    """One E-tile: out = relu(x @ w_tile + b_tile), full K in a single MXU pass."""
    acc = jnp.dot(x_ref[...], w_ref[...], preferred_element_type=jnp.float32)
    o_ref[...] = jnp.maximum(acc + b_ref[...], 0.0).astype(o_ref.dtype)


def _pick_tile_n(E):
    """Largest lane-dense tile that still leaves >= 2 blocks on the E axis
    (keeps both v7x TensorCores busy) and fits comfortably in VMEM when
    double-buffered in bf16 (2 * 4096 * tile_n * 2 bytes <= 16 MiB @ 1024)."""
    for t in (1024, 512, 256, 128):
        if E % t == 0 and E // t >= 2:
            return t
    # Fallback: single block covering all of E ("block equals full array dim"
    # escape also handles E that is not a multiple of 128, e.g. E=1000).
    return E


def img_encoder_forward(x, w_t, b, *, tile_n=None):
    """relu(x @ w_t + b) with x:(B,K) f32, w_t:(K,E), b:(1,E)."""
    B, K = x.shape
    K2, E = w_t.shape
    assert K == K2 and b.shape == (1, E)

    if tile_n is None:
        tile_n = _pick_tile_n(E)
    assert E % tile_n == 0

    out_dtype = x.dtype

    # Stream weights (and the tiny resident x) in bf16: this kernel is pure
    # HBM-bandwidth on the 4096 x E weight, so halving its bytes ~halves wall
    # clock on every TPU generation. Accumulation stays f32 on the MXU.
    x_bf16 = x.astype(jnp.bfloat16)
    w_bf16 = w_t.astype(jnp.bfloat16)
    b_f32 = b.astype(jnp.float32)

    grid = (E // tile_n,)

    return pl.pallas_call(
        _linear_relu_kernel,
        out_shape=jax.ShapeDtypeStruct((B, E), out_dtype),
        grid_spec=pltpu.PrefetchScalarGridSpec(
            num_scalar_prefetch=0,
            grid=grid,
            in_specs=[
                # x: constant block index -> DMA'd once, resident across grid.
                pl.BlockSpec((B, K), lambda n: (0, 0)),
                # weight: streamed one E-tile per grid step (double-buffered).
                pl.BlockSpec((K, tile_n), lambda n: (0, n)),
                # bias tile.
                pl.BlockSpec((1, tile_n), lambda n: (0, n)),
            ],
            out_specs=pl.BlockSpec((B, tile_n), lambda n: (0, n)),
        ),
        compiler_params=pltpu.CompilerParams(
            dimension_semantics=("parallel",),
            vmem_limit_bytes=48 * 1024 * 1024,
        ),
    )(x_bf16, w_bf16, b_f32)


if __name__ == "__main__":
    # Module-implied shapes: in_features = 4096 (fixed by nn.Linear(4096, E)).
    # Small embedding size and batch for the example run.
    B = 8
    IN_FEATURES = 4096
    EMBEDDING_SIZE = 256

    key = jax.random.PRNGKey(0)
    kx, kw, kb = jax.random.split(key, 3)

    # Deterministic synthetic parameters (nn.Linear-style uniform init bound).
    bound = 1.0 / (IN_FEATURES ** 0.5)
    w = jax.random.uniform(kw, (EMBEDDING_SIZE, IN_FEATURES),
                           minval=-bound, maxval=bound, dtype=jnp.float32)
    b = jax.random.uniform(kb, (EMBEDDING_SIZE,),
                           minval=-bound, maxval=bound, dtype=jnp.float32)
    x = jax.random.normal(kx, (B, IN_FEATURES), dtype=jnp.float32)

    w_t = w.T                       # (in, out) for the kernel
    b2d = b.reshape(1, EMBEDDING_SIZE)

    out = img_encoder_forward(x, w_t, b2d)
    out = jax.block_until_ready(out)

    # Reference check (plain JAX, f32) mirroring torch semantics. Tolerance is
    # loosened because the kernel streams x/w in bf16 (f32 accumulation).
    ref = jnp.maximum(x @ w.T + b, 0.0)
    assert out.shape == (B, EMBEDDING_SIZE)
    assert out.dtype == x.dtype
    assert jnp.allclose(out, ref, atol=2e-2, rtol=2e-2)

    print("KERNEL_OK")
</pallas_src>

<mosaic_0001>
module attributes {stable_mosaic.version = 11 : i64} {
  func.func @_linear_relu_kernel(%arg0: i32, %arg1: memref<8x4096xbf16, #tpu.memory_space<vmem>>, %arg2: memref<4096x128xbf16, #tpu.memory_space<vmem>>, %arg3: memref<1x128xf32, #tpu.memory_space<vmem>>, %arg4: memref<8x128xf32, #tpu.memory_space<vmem>>) attributes {dimension_semantics = [#tpu.dimension_semantics<parallel>], iteration_bounds = array<i64: 2>, scalar_prefetch = 0 : i64, scratch_operands = 0 : i64, tpu.core_type = #tpu.core_type<tc>, window_params = [{pipeline_mode = #tpu.pipeline_mode<synchronous>, transform_indices = @transform_0, window_bounds = array<i64: 8, 4096>}, {transform_indices = @transform_1, window_bounds = array<i64: 4096, 128>}, {transform_indices = @transform_2, window_bounds = array<i64: 1, 128>}, {transform_indices = @transform_3, window_bounds = array<i64: 8, 128>}]} {
    %c0 = arith.constant 0 : index
    %c0_0 = arith.constant 0 : index
    %0 = vector.load %arg1[%c0, %c0_0] : memref<8x4096xbf16, #tpu.memory_space<vmem>>, vector<8x4096xbf16>
    %c0_1 = arith.constant 0 : index
    %c0_2 = arith.constant 0 : index
    %1 = vector.load %arg2[%c0_1, %c0_2] : memref<4096x128xbf16, #tpu.memory_space<vmem>>, vector<4096x128xbf16>
    %cst = arith.constant dense<0.000000e+00> : vector<8x128xf32>
    %2 = tpu.matmul %0, %1, %cst {dimension_numbers = #tpu.dot_dimension_numbers<[1], [0], [0], [1], [0, 0, 1, 1], [], []>} : vector<8x4096xbf16>, vector<4096x128xbf16>, vector<8x128xf32> -> vector<8x128xf32>
    %c0_3 = arith.constant 0 : index
    %c0_4 = arith.constant 0 : index
    %3 = vector.load %arg3[%c0_3, %c0_4] : memref<1x128xf32, #tpu.memory_space<vmem>>, vector<1x128xf32>
    %4 = vector.broadcast %3 : vector<1x128xf32> to vector<8x128xf32>
    %5 = arith.addf %2, %4 : vector<8x128xf32>
    %cst_5 = arith.constant 0.000000e+00 : f32
    %6 = vector.broadcast %cst_5 : f32 to vector<8x128xf32>
    %7 = arith.maximumf %5, %6 : vector<8x128xf32>
    %c0_6 = arith.constant 0 : index
    %c0_7 = arith.constant 0 : index
    %8 = vector.load %arg4[%c0_6, %c0_7] : memref<8x128xf32, #tpu.memory_space<vmem>>, vector<8x128xf32>
    tpu.vector_store %arg4[%c0_6, %c0_7], %7 {strides = array<i32>} : memref<8x128xf32, #tpu.memory_space<vmem>>, vector<8x128xf32>,
    return
  }
  func.func @transform_0(%arg0: i32) -> (i32, i32) {
    %c0_i32 = arith.constant 0 : i32
    %c0_i32_0 = arith.constant 0 : i32
    %c0_i32_1 = arith.constant 0 : i32
    return %c0_i32, %c0_i32_0 : i32, i32
  }
  func.func @transform_1(%arg0: i32) -> (i32, i32) {
    %c0_i32 = arith.constant 0 : i32
    %c0_i32_0 = arith.constant 0 : i32
    return %c0_i32, %arg0 : i32, i32
  }
  func.func @transform_2(%arg0: i32) -> (i32, i32) {
    %c0_i32 = arith.constant 0 : i32
    %c0_i32_0 = arith.constant 0 : i32
    return %c0_i32, %arg0 : i32, i32
  }
  func.func @transform_3(%arg0: i32) -> (i32, i32) {
    %c0_i32 = arith.constant 0 : i32
    %c0_i32_0 = arith.constant 0 : i32
    return %c0_i32, %arg0 : i32, i32
  }
}

</mosaic_0001>

<bundles_post_ra>
// kernel: tpu_custom_call.1
= control target key start
LH: loop header
LB: loop body
LE: loop exit
PB: predicated region body
PF: predicated region fallthrough
CT: control target
= control target key end

     0   :  { %8 = vsyncpa [#allocation3], 0  ;;  %s4934_s0 = inlined_call_operand.hbm [shape: bf16[8,4096], index: 0, kind: input, shape index: {}]   ;;  %s4935_s1 = inlined_call_operand.hbm [shape: bf16[4096,256], index: 1, kind: input, shape index: {}]   ;;  %s4936_s2 = inlined_call_operand.hbm [shape: f32[1,256], index: 2, kind: input, shape index: {}]   ;;  %s4937_s3 = inlined_call_operand.hbm [shape: f32[8,256], index: 3, kind: output, shape index: {}]  }
   0x1   :  { %9 = vsyncpa [#allocation6], 0 }
   0x2   :  { %11 = vsyncpa [#allocation6 + $0x1], 0 }
   0x3   :  { %12 = vsyncpa [#allocation4], 0 }
   0x4   :  { %14 = vsyncpa [#allocation4 + $0x1], 0  ;;  %s4495_s12 = smov 0   ;;  %s4497_s13 = smov 0  }
   0x5   :  { %s4499_s14 = smov 0   ;;  %s4501_s15 = smov 0  }
   0x6 LB: > { %s4516_s16 = sadd.s32 1, %s4469_s15   ;;  %s48_s17 = sadd.s32 1, %s4465_s14  ;;  %s4469_s15 = sphi %s4501_s15, %s4950_s15   ;;  %s4465_s14 = sphi %s4499_s14, %s4949_s14   ;;  %s4461_s13 = sphi %s4497_s13, %s4948_s13   ;;  %s4457_s12 = sphi %s4495_s12, %s4947_s12  }
   0x7   : > { %s45_s18 = ssub.s32 %s4469_s15, %s4516_s16  ;;  %p55_p0 = scmp.ne.s32.totalorder %s4465_s14, %s4461_s13 }
   0x8   : > { %p46_p1 = scmp.eq.s32.totalorder %s45_s18, 0  ;;  %p56_p2 = scmp.eq.s32.totalorder %s4469_s15, 0 }
   0x9   : > { %p4269_p4 = scmp.lt.s32.totalorder %s4469_s15, 2  ;;  %s149_s20 = sand.u32 1, %s4469_s15  }
   0xa   : > { %s4527_s19 = scalar_select %p46_p1, %s4465_s14, %s48_s17  }
   0xb   : > { %p57_p5 = por %p56_p2, %p55_p0  ;;  %s151_s21 = sand.u32 1, %s4465_s14  }
   0xc   : > { %s2953_s22 = sshll.u32 %s151_s21, 11  ;;  %s2954_s23 = sshll.u32 %s4469_s15, 2 }
   0xd   : > { %s157_s26 = scalar_lea.hbm %s4935_s1, %s2954_s23  ;;  %s153_s28 = scalar_lea.vmem [#allocation5], %s2953_s22 }
   0xe   : > { %s158_s27 = sshll.u32 %s157_s26, 4  ;;  %s160_s29 = sshll.u32 %s153_s28, 4  ;;  %s159_s27 = int_to_ptr.hbm [resolvable:$true] %s158_s27  ;;  %s161_s29 = int_to_ptr.vmem [resolvable:$true] %s160_s29 }
   0xf   : > { %p4542_p6 = pnand %p4269_p4, %p57_p5  ;;  %s4546_s4 = scalar_lea.sflag [#allocation6], %s149_s20 }
  0x10   : > { %s4309_s5 = sshra.s32 %s159_s27, 4  ;;  %s4316_s9 = scalar_lea.hbm %s4935_s1, 4096  ;;  %s4310_s5 = int_to_ptr.hbm [resolvable:$true] %s4309_s5 }
  0x11   : > { %s4311_s6 = scalar_lea.hbm %s4310_s5, 2048  ;;  %p4313_p8 = pneg %p4542_p6 }
  0x12   : > { %p4312_p7 = scmp.ne.s32.totalorder %s4310_s5, %s4311_s6  ;;  %p4317_p11 = scmp.lt.s32.totalorder %s4310_s5, %s4935_s1 }
  0x13   : > { %p4318_p12 = scmp.lt.s32.totalorder %s4316_s9, %s4311_s6 }
  0x14   : > { %p4314_p9 = pnand %p4313_p8, %p4312_p7 }
  0x15   : > { %p4319_p13 = por %p4318_p12, %p4317_p11 }
  0x16   : > { %p4315_p10 = pneg %p4314_p9 }
  0x18   : > { %p4320_p1 = pnand %p4319_p13, %p4315_p10 }
  0x1a   : > { %4323 = shalt.err (!%p4320_p1)
}
  0x1b   : > { %s4471_s17 = smov 128   ;;  %s4472_s18 = smov 64  }
  0x1c   : > { %s4473_s20 = smov 4   ;;  %s4563_s22 = sadd.s32 4294967295, %s4469_s15  }
  0x1d   : > { %4260 = dma.hbm_to_vmem [thread:$0]  (!%p4542_p6), %s159_s27, 32768, %s161_s29, %s4546_s4, %s4471_s17, %s4472_s18, %s4473_s20  }
  0x1e   : > { %s2949_s23 = sadd.s32 4294967294, %s4469_s15   ;;  %p61_p2 = scmp.ne.s32.totalorder %s4461_s13, %s4457_s12 }
  0x1f   : > { %p4938_p4 = scmp.eq.s32.totalorder %s4563_s22, 0  ;;  %p111_p5 = scmp.eq.s32.totalorder %s4563_s22, 1 }
  0x20   : > { %p117_p7 = scmp.eq.s32.totalorder %s2949_s23, 1  ;;  %p2950_p9 = scmp.ge.s32.totalorder %s4469_s15, 1 }
  0x21   : > { %p4573_p10 = por %p4938_p4, %p61_p2  ;;  %p4580_p11 = por %p111_p5, %p55_p0 }
  0x22   : > { %p4584_p12 = por %p117_p7, %p61_p2  ;;  %p124_p13 = scmp.lt.s32.totalorder %s4469_s15, 3 }
  0x23   : > { %s136_s29 = sshll.u32 %s4934_s0, 4  ;;  %s4474_s6 = smov [#allocation2]   ;;  %s137_s29 = int_to_ptr.hbm [resolvable:$true] %s136_s29 }
  0x24   : > { %p4592_p1 = pnand %p2950_p9, %p124_p13  ;;  %s138_s7 = sshll.u32 %s4474_s6, 4  ;;  %s139_s7 = int_to_ptr.vmem [resolvable:$true] %s138_s7 }
  0x25   : > { %s176_s10 = scalar_lea.hbm %s4936_s2, %s4469_s15  ;;  %s173_s17 = scalar_lea.vmem [#allocation7], %s151_s21 }
  0x26   : > { %p4253_p0 = pneg %p4592_p1  ;;  %s178_s11 = sshll.u32 %s176_s10, 4  ;;  %s179_s11 = int_to_ptr.hbm [resolvable:$true] %s178_s11 }
  0x27   : > { %s180_s18 = sshll.u32 %s173_s17, 4  ;;  %s4369_s20 = sshra.s32 %s179_s11, 4  ;;  %s181_s18 = int_to_ptr.vmem [resolvable:$true] %s180_s18  ;;  %s4370_s20 = int_to_ptr.hbm [resolvable:$true] %s4369_s20 }
  0x28   : > { %p4254_p2 = pnand %p4253_p0, %p4938_p4  ;;  %s4371_s23 = scalar_lea.hbm %s4370_s20, 1 }
  0x29   : > { %p4372_p5 = scmp.ne.s32.totalorder %s4370_s20, %s4371_s23  ;;  %s4376_s6 = scalar_lea.hbm %s4936_s2, 2 }
  0x2a   : > { %4256 = dma.hbm_to_vmem [thread:$0]  (!%p4254_p2), %s137_s29, 2048, %s139_s7, [#allocation3]  }
  0x2b   : > { %p4374_p7 = pnand %p4372_p5, %p4313_p8  ;;  %p4377_p13 = scmp.lt.s32.totalorder %s4370_s20, %s4936_s2 }
  0x2c   : > { %p4378_p0 = scmp.lt.s32.totalorder %s4376_s6, %s4371_s23 }
  0x2d   : > { %p4375_p9 = pneg %p4374_p7 }
  0x2e   : > { %p4379_p3 = por %p4378_p0, %p4377_p13 }
  0x30   : > { %p4380_p4 = pnand %p4379_p3, %p4375_p9 }
  0x32   : > { %4383 = shalt.err (!%p4380_p4)
}
  0x33   : > { %4263 = dma.hbm_to_vmem [thread:$0]  (!%p4542_p6), %s179_s11, 16, %s181_s18, %s4546_s4  }
  0x34   : > { %189 = sbr.rel (%p4592_p1) target bundleno = 463 (0x1cf), region = 32  ;;  %p4944_p8 = scmp.eq.s32.totalorder (!%p4592_p1), %s4563_s22, 0 }
  0x39   : > { %4444 = dma.done.wait (%p4944_p8), [#allocation3], 2048   ;;  %p4945_p2 = pmov %p4944_p8 }
  0x3a   : > { %s196_s21 = sand.u32 1, %s4563_s22   ;;  %s4626_s29 = sand.u32 1, %s4461_s13  }
  0x3b   : > { %4446 = vsyncadd (%p4945_p2), [#allocation3], 4294965248  ;;  %s2957_s7 = sshll.u32 %s4626_s29, 11  ;;  %s197_s30 = scalar_lea.sflag [#allocation6], %s196_s21 }
  0x3c   : > { %s4629_s10 = scalar_lea.vmem [#allocation5], %s2957_s7 }
  0x3d   : > { %4448 = dma.done.wait (%p4573_p10), %s197_s30, 32784  }
  0x3e   : > { %4450 = vsyncadd (%p4573_p10), %s197_s30, 4294934512  ;;  %v3994_v0 = vld [vmem:[%s4629_s10 + $0x38] sm:$0xff]  ;;  %v3993_v4 = vld [vmem:[%s4629_s10 + $0x30] sm:$0xff]  ;;  %s209_s4 = scalar_lea.vmem [#allocation7], %s4626_s29  ;;  %s2958_s24 = sshll.u32 %s4626_s29, 3 }
  0x3f   : > { %v4002_v1 = vld [vmem:[%s4629_s10 + $0x78] sm:$0xff]  ;;  %2417 = vmatpush.bf16.msra.mxu0 %v3994_v0  ;;  %v4001_v5 = vld [vmem:[%s4629_s10 + $0x70] sm:$0xff]  ;;  %v3992_v8 = vld [vmem:[%s4629_s10 + $0x28] sm:$0xff]  ;;  %s3984_s5 = sshll.u32 %s4563_s22, 3  ;;  %s236_s20 = scalar_lea.vmem [#allocation8], %s2958_s24 }
  0x40   : > { %v4010_v2 = vld [vmem:[%s4629_s10 + $0xb8] sm:$0xff]  ;;  %2430 = vmatpush.bf16.msra.mxu1 %v4002_v1  ;;  %v4009_v6 = vld [vmem:[%s4629_s10 + $0xb0] sm:$0xff]  ;;  %v4000_v9 = vld [vmem:[%s4629_s10 + $0x68] sm:$0xff]  ;;  %s2846_s18 = scalar_lea.hbm %s4937_s3, %s3984_s5  ;;  %s2848_s23 = sshll.u32 %s236_s20, 4  ;;  %s2849_s23 = int_to_ptr.vmem [resolvable:$true] %s2848_s23 }
  0x41   : > { %v4018_v3 = vld [vmem:[%s4629_s10 + $0xf8] sm:$0xff]  ;;  %2443 = vmatpush.bf16.msra.mxu2 %v4010_v2  ;;  %v4017_v7 = vld [vmem:[%s4629_s10 + $0xf0] sm:$0xff]  ;;  %v4008_v10 = vld [vmem:[%s4629_s10 + $0xa8] sm:$0xff]  ;;  %s2850_s27 = sshll.u32 %s2846_s18, 4  ;;  %s2836_s22 = scalar_lea.sflag [#allocation4], %s4626_s29  ;;  %s2851_s27 = int_to_ptr.hbm [resolvable:$true] %s2850_s27 }
  0x42   : > { %2456 = vmatpush.bf16.msra.mxu3 %v4018_v3  ;;  %v4016_v11 = vld [vmem:[%s4629_s10 + $0xe8] sm:$0xff]  ;;  %v3991_v12 = vld [vmem:[%s4629_s10 + $0x20] sm:$0xff]  ;;  %v3990_v16 = vld [vmem:[%s4629_s10 + $0x18] sm:$0xff]  ;;  %s4413_s28 = sshra.s32 %s2851_s27, 4  ;;  %s4419_s21 = scalar_lea.hbm %s4937_s3, 16  ;;  %s4414_s28 = int_to_ptr.hbm [resolvable:$true] %s4413_s28 }
  0x43   : > { %2418 = vmatpush.bf16.msra.mxu0 %v3993_v4  ;;  %v3999_v13 = vld [vmem:[%s4629_s10 + $0x60] sm:$0xff]  ;;  %v3998_v17 = vld [vmem:[%s4629_s10 + $0x58] sm:$0xff]  ;;  %v3989_v20 = vld [vmem:[%s4629_s10 + $0x10] sm:$0xff]  ;;  %s4415_s6 = scalar_lea.hbm %s4414_s28, 8  ;;  %p4420_p10 = scmp.lt.s32.totalorder %s4414_s28, %s4937_s3 }
  0x44   : > { %2431 = vmatpush.bf16.msra.mxu1 %v4001_v5  ;;  %v4007_v14 = vld [vmem:[%s4629_s10 + $0xa0] sm:$0xff]  ;;  %v4006_v18 = vld [vmem:[%s4629_s10 + $0x98] sm:$0xff]  ;;  %v3997_v21 = vld [vmem:[%s4629_s10 + $0x50] sm:$0xff]  ;;  %p4416_p3 = scmp.ne.s32.totalorder %s4414_s28, %s4415_s6  ;;  %p4421_p1 = scmp.lt.s32.totalorder %s4419_s21, %s4415_s6 }
  0x45   : > { %2444 = vmatpush.bf16.msra.mxu2 %v4009_v6  ;;  %v4015_v15 = vld [vmem:[%s4629_s10 + $0xe0] sm:$0xff]  ;;  %v4014_v19 = vld [vmem:[%s4629_s10 + $0xd8] sm:$0xff]  ;;  %v4005_v22 = vld [vmem:[%s4629_s10 + $0x90] sm:$0xff] }
  0x46   : > { %2457 = vmatpush.bf16.msra.mxu3 %v4017_v7  ;;  %v4013_v23 = vld [vmem:[%s4629_s10 + $0xd0] sm:$0xff]  ;;  %v3988_v24 = vld [vmem:[%s4629_s10 + $0x8] sm:$0xff]  ;;  %v237_v29 = vld [vmem:[#allocation2] sm:$0xff]  ;;  %p4417_p6 = pnand %p4416_p3, %p4580_p11  ;;  %p4422_p5 = por %p4421_p1, %p4420_p10 }
  0x47   : > { %2419 = vmatpush.bf16.msra.mxu0 %v3992_v8  ;;  %v3996_v25 = vld [vmem:[%s4629_s10 + $0x48] sm:$0xff]  ;;  %v3987_v30 = vld [vmem:[%s4629_s10] sm:$0xff]  ;;  %v785_v33 = vunpack.c.l.b16 %v237_v29  ;;  %v786_v37 = vunpack.c.h.b16 %v237_v29  ;;  %v4026_v38 = vld [vmem:[%s4629_s10 + $0x138] sm:$0xff] }
  0x48   : > { %2432 = vmatpush.bf16.msra.mxu1 %v4000_v9  ;;  %v4004_v26 = vld [vmem:[%s4629_s10 + $0x88] sm:$0xff]  ;;  %v3995_v31 = vld [vmem:[%s4629_s10 + $0x40] sm:$0xff]  ;;  %v4034_v39 = vld [vmem:[%s4629_s10 + $0x178] sm:$0xff]  ;;  %p4418_p4 = pneg %p4417_p6 }
  0x49   : > { %2445 = vmatpush.bf16.msra.mxu2 %v4008_v10  ;;  %v4012_v27 = vld [vmem:[%s4629_s10 + $0xc8] sm:$0xff]  ;;  %v4003_v34 = vld [vmem:[%s4629_s10 + $0x80] sm:$0xff]  ;;  %v4042_v40 = vld [vmem:[%s4629_s10 + $0x1b8] sm:$0xff]  ;;  %v817_v43 = vpack.c.b16 %v785_v33, %v785_v33  ;;  %v818_v45 = vpack.c.b16 %v786_v37, %v786_v37 }
  0x4a   : > { %2458 = vmatpush.bf16.msra.mxu3 %v4016_v11  ;;  %v238_v28 = vld [vmem:[#allocation2 + $0x8] sm:$0xff]  ;;  %v4011_v35 = vld [vmem:[%s4629_s10 + $0xc0] sm:$0xff]  ;;  %v4050_v41 = vld [vmem:[%s4629_s10 + $0x1f8] sm:$0xff]  ;;  %p4423_p7 = pnand %p4422_p5, %p4418_p4 }
  0x4b   : > { %2420 = vmatpush.bf16.msra.mxu0 %v3991_v12  ;;  %v787_v32 = vunpack.c.l.b16 %v238_v28  ;;  %v788_v36 = vunpack.c.h.b16 %v238_v28  ;;  %v4025_v46 = vld [vmem:[%s4629_s10 + $0x130] sm:$0xff]  ;;  %v4024_v50 = vld [vmem:[%s4629_s10 + $0x128] sm:$0xff]  ;;  %v4023_v54 = vld [vmem:[%s4629_s10 + $0x120] sm:$0xff] }
  0x4c   : > { %2433 = vmatpush.bf16.msra.mxu1 %v3999_v13  ;;  %v4033_v47 = vld [vmem:[%s4629_s10 + $0x170] sm:$0xff]  ;;  %v4032_v51 = vld [vmem:[%s4629_s10 + $0x168] sm:$0xff]  ;;  %v4031_v55 = vld [vmem:[%s4629_s10 + $0x160] sm:$0xff] }
  0x4d   : > { %2446 = vmatpush.bf16.msra.mxu2 %v4007_v14  ;;  %v819_v42 = vpack.c.b16 %v787_v32, %v787_v32  ;;  %v820_v44 = vpack.c.b16 %v788_v36, %v788_v36  ;;  %v4041_v48 = vld [vmem:[%s4629_s10 + $0x1b0] sm:$0xff]  ;;  %v4040_v52 = vld [vmem:[%s4629_s10 + $0x1a8] sm:$0xff]  ;;  %v4039_v56 = vld [vmem:[%s4629_s10 + $0x1a0] sm:$0xff] }
  0x4e   : > { %2459 = vmatpush.bf16.msra.mxu3 %v4015_v15  ;;  %v4049_v49 = vld [vmem:[%s4629_s10 + $0x1f0] sm:$0xff]  ;;  %v4048_v53 = vld [vmem:[%s4629_s10 + $0x1e8] sm:$0xff]  ;;  %v4047_v57 = vld [vmem:[%s4629_s10 + $0x1e0] sm:$0xff] }
  0x4f   : > { %2421 = vmatpush.bf16.msra.mxu0 %v3990_v16  ;;  %v4022_v58 = vld [vmem:[%s4629_s10 + $0x118] sm:$0xff]  ;;  %v4021_v62 = vld [vmem:[%s4629_s10 + $0x110] sm:$0xff]  ;;  %v4020_v2 = vld [vmem:[%s4629_s10 + $0x108] sm:$0xff] }
  0x50   : > { %2434 = vmatpush.bf16.msra.mxu1 %v3998_v17  ;;  %v4030_v59 = vld [vmem:[%s4629_s10 + $0x158] sm:$0xff]  ;;  %v4029_v63 = vld [vmem:[%s4629_s10 + $0x150] sm:$0xff]  ;;  %v4028_v3 = vld [vmem:[%s4629_s10 + $0x148] sm:$0xff] }
  0x51   : > { %2447 = vmatpush.bf16.msra.mxu2 %v4006_v18  ;;  %v4038_v60 = vld [vmem:[%s4629_s10 + $0x198] sm:$0xff]  ;;  %v4037_v0 = vld [vmem:[%s4629_s10 + $0x190] sm:$0xff]  ;;  %v4036_v4 = vld [vmem:[%s4629_s10 + $0x188] sm:$0xff] }
  0x52   : > { %2460 = vmatpush.bf16.msra.mxu3 %v4014_v19  ;;  %v4046_v61 = vld [vmem:[%s4629_s10 + $0x1d8] sm:$0xff]  ;;  %v4045_v1 = vld [vmem:[%s4629_s10 + $0x1d0] sm:$0xff]  ;;  %v4044_v5 = vld [vmem:[%s4629_s10 + $0x1c8] sm:$0xff] }
  0x53   : > { %2422 = vmatpush.bf16.msra.mxu0 %v3989_v20  ;;  %v240_v6 = vld [vmem:[#allocation2 + $0x18] sm:$0xff]  ;;  %v239_v7 = vld [vmem:[#allocation2 + $0x10] sm:$0xff]  ;;  %v4019_v8 = vld [vmem:[%s4629_s10 + $0x100] sm:$0xff] }
  0x54   : > { %2435 = vmatpush.bf16.msra.mxu1 %v3997_v21  ;;  %v4027_v9 = vld [vmem:[%s4629_s10 + $0x140] sm:$0xff]  ;;  %v791_v10 = vunpack.c.l.b16 %v240_v6  ;;  %v789_v11 = vunpack.c.l.b16 %v239_v7  ;;  %v792_v14 = vunpack.c.h.b16 %v240_v6  ;;  %v790_v15 = vunpack.c.h.b16 %v239_v7  ;;  %v4058_v16 = vld [vmem:[%s4629_s10 + $0x238] sm:$0xff]  ;;  %v4056_v28 = vld [vmem:[%s4629_s10 + $0x228] sm:$0xff] }
  0x55   : > { %2448 = vmatpush.bf16.msra.mxu2 %v4005_v22  ;;  %v4035_v12 = vld [vmem:[%s4629_s10 + $0x180] sm:$0xff]  ;;  %v4066_v17 = vld [vmem:[%s4629_s10 + $0x278] sm:$0xff]  ;;  %v4064_v29 = vld [vmem:[%s4629_s10 + $0x268] sm:$0xff] }
  0x56   : > { %2461 = vmatpush.bf16.msra.mxu3 %v4013_v23  ;;  %v4043_v13 = vld [vmem:[%s4629_s10 + $0x1c0] sm:$0xff]  ;;  %v4074_v18 = vld [vmem:[%s4629_s10 + $0x2b8] sm:$0xff]  ;;  %v823_v20 = vpack.c.b16 %v791_v10, %v791_v10  ;;  %v821_v21 = vpack.c.b16 %v789_v11, %v789_v11  ;;  %v824_v22 = vpack.c.b16 %v792_v14, %v792_v14  ;;  %v822_v23 = vpack.c.b16 %v790_v15, %v790_v15  ;;  %v4088_v6 = vld [vmem:[%s4629_s10 + $0x328] sm:$0xff] }
  0x57   : > { %2423 = vmatpush.bf16.msra.mxu0 %v3988_v24  ;;  %v4082_v19 = vld [vmem:[%s4629_s10 + $0x2f8] sm:$0xff]  ;;  %v4057_v24 = vld [vmem:[%s4629_s10 + $0x230] sm:$0xff]  ;;  %v4055_v32 = vld [vmem:[%s4629_s10 + $0x220] sm:$0xff] }
  0x58   : > { %2436 = vmatpush.bf16.msra.mxu1 %v3996_v25  ;;  %v4065_v25 = vld [vmem:[%s4629_s10 + $0x270] sm:$0xff]  ;;  %v4063_v33 = vld [vmem:[%s4629_s10 + $0x260] sm:$0xff]  ;;  %v4054_v36 = vld [vmem:[%s4629_s10 + $0x218] sm:$0xff] }
  0x59   : > { %2449 = vmatpush.bf16.msra.mxu2 %v4004_v26  ;;  %v4073_v26 = vld [vmem:[%s4629_s10 + $0x2b0] sm:$0xff]  ;;  %v4062_v37 = vld [vmem:[%s4629_s10 + $0x258] sm:$0xff]  ;;  %v4096_v7 = vld [vmem:[%s4629_s10 + $0x368] sm:$0xff] }
  0x5a   : > { %2462 = vmatpush.bf16.msra.mxu3 %v4012_v27  ;;  %v4081_v27 = vld [vmem:[%s4629_s10 + $0x2f0] sm:$0xff]  ;;  %v4087_v10 = vld [vmem:[%s4629_s10 + $0x320] sm:$0xff]  ;;  %v4086_v14 = vld [vmem:[%s4629_s10 + $0x318] sm:$0xff] }
  0x5b   : > { %2424 = vmatpush.bf16.msra.mxu0 %v3987_v30  ;;  %v4072_v30 = vld [vmem:[%s4629_s10 + $0x2a8] sm:$0xff]  ;;  %v4095_v11 = vld [vmem:[%s4629_s10 + $0x360] sm:$0xff]  ;;  %v4094_v15 = vld [vmem:[%s4629_s10 + $0x358] sm:$0xff] }
  0x5c   : > { %2437 = vmatpush.bf16.msra.mxu1 %v3995_v31  ;;  %v4080_v31 = vld [vmem:[%s4629_s10 + $0x2e8] sm:$0xff] }
  0x5d   : > { %2450 = vmatpush.bf16.msra.mxu2 %v4003_v34  ;;  %v4071_v34 = vld [vmem:[%s4629_s10 + $0x2a0] sm:$0xff] }
  0x5e   : > { %2463 = vmatpush.bf16.msra.mxu3 %v4011_v35  ;;  %2425 = vmatmul.bf16.vlgmr.msra.gmra.mxu0 %v817_v43  ;;  %v4079_v35 = vld [vmem:[%s4629_s10 + $0x2e0] sm:$0xff]  ;;  %v4077_v43 = vld [vmem:[%s4629_s10 + $0x2d0] sm:$0xff] }
  0x5f   : > { %2469 = vmatpush.bf16.msrb.mxu0 %v4026_v38  ;;  %2438 = vmatmul.bf16.vlgmr.msra.gmra.mxu1 %v818_v45  ;;  %v4070_v38 = vld [vmem:[%s4629_s10 + $0x298] sm:$0xff]  ;;  %v4060_v45 = vld [vmem:[%s4629_s10 + $0x248] sm:$0xff] }
  0x60   : > { %2482 = vmatpush.bf16.msrb.mxu1 %v4034_v39  ;;  %2451 = vmatmul.bf16.vlgmr.msra.gmra.mxu2 %v819_v42  ;;  %v4078_v39 = vld [vmem:[%s4629_s10 + $0x2d8] sm:$0xff]  ;;  %v4069_v42 = vld [vmem:[%s4629_s10 + $0x290] sm:$0xff] }
  0x61   : > { %2495 = vmatpush.bf16.msrb.mxu2 %v4042_v40  ;;  %2464 = vmatmul.bf16.vlgmr.msra.gmra.mxu3 %v820_v44  ;;  %v4053_v40 = vld [vmem:[%s4629_s10 + $0x210] sm:$0xff]  ;;  %v4052_v44 = vld [vmem:[%s4629_s10 + $0x208] sm:$0xff] }
  0x62   : > { %2508 = vmatpush.bf16.msrb.mxu3 %v4050_v41  ;;  %v4061_v41 = vld [vmem:[%s4629_s10 + $0x250] sm:$0xff] }
  0x63   : > { %2470 = vmatpush.bf16.msrb.mxu0 %v4025_v46  ;;  %v4068_v46 = vld [vmem:[%s4629_s10 + $0x288] sm:$0xff] }
  0x64   : > { %2483 = vmatpush.bf16.msrb.mxu1 %v4033_v47  ;;  %v4076_v47 = vld [vmem:[%s4629_s10 + $0x2c8] sm:$0xff] }
  0x65   : > { %2496 = vmatpush.bf16.msrb.mxu2 %v4041_v48  ;;  %v241_v48 = vld [vmem:[#allocation2 + $0x20] sm:$0xff] }
  0x66   : > { %2509 = vmatpush.bf16.msrb.mxu3 %v4049_v49  ;;  %v242_v49 = vld [vmem:[#allocation2 + $0x28] sm:$0xff] }
  0x67   : > { %2471 = vmatpush.bf16.msrb.mxu0 %v4024_v50  ;;  %v4051_v50 = vld [vmem:[%s4629_s10 + $0x200] sm:$0xff] }
  0x68   : > { %2484 = vmatpush.bf16.msrb.mxu1 %v4032_v51  ;;  %v4059_v51 = vld [vmem:[%s4629_s10 + $0x240] sm:$0xff] }
  0x69   : > { %2497 = vmatpush.bf16.msrb.mxu2 %v4040_v52  ;;  %v793_v52 = vunpack.c.l.b16 %v241_v48 }
  0x6a   : > { %2510 = vmatpush.bf16.msrb.mxu3 %v4048_v53  ;;  %v795_v53 = vunpack.c.l.b16 %v242_v49 }
  0x6b   : > { %2472 = vmatpush.bf16.msrb.mxu0 %v4023_v54  ;;  %v4067_v54 = vld [vmem:[%s4629_s10 + $0x280] sm:$0xff] }
  0x6c   : > { %2485 = vmatpush.bf16.msrb.mxu1 %v4031_v55  ;;  %v4075_v55 = vld [vmem:[%s4629_s10 + $0x2c0] sm:$0xff] }
  0x6d   : > { %2498 = vmatpush.bf16.msrb.mxu2 %v4039_v56  ;;  %v794_v56 = vunpack.c.h.b16 %v241_v48  ;;  %v4120_v48 = vld [vmem:[%s4629_s10 + $0x428] sm:$0xff] }
  0x6e   : > { %2511 = vmatpush.bf16.msrb.mxu3 %v4047_v57  ;;  %v796_v57 = vunpack.c.h.b16 %v242_v49  ;;  %v4128_v49 = vld [vmem:[%s4629_s10 + $0x468] sm:$0xff] }
  0x6f   : > { %2473 = vmatpush.bf16.msrb.mxu0 %v4022_v58  ;;  %v4090_v58 = vld [vmem:[%s4629_s10 + $0x338] sm:$0xff] }
  0x70   : > { %2486 = vmatpush.bf16.msrb.mxu1 %v4030_v59  ;;  %v4098_v59 = vld [vmem:[%s4629_s10 + $0x378] sm:$0xff] }
  0x71   : > { %2499 = vmatpush.bf16.msrb.mxu2 %v4038_v60  ;;  %v4106_v60 = vld [vmem:[%s4629_s10 + $0x3b8] sm:$0xff] }
  0x72   : > { %2512 = vmatpush.bf16.msrb.mxu3 %v4046_v61  ;;  %v4114_v61 = vld [vmem:[%s4629_s10 + $0x3f8] sm:$0xff] }
  0x73   : > { %2474 = vmatpush.bf16.msrb.mxu0 %v4021_v62  ;;  %v825_v62 = vpack.c.b16 %v793_v52, %v793_v52  ;;  %v4119_v52 = vld [vmem:[%s4629_s10 + $0x420] sm:$0xff] }
  0x74   : > { %2487 = vmatpush.bf16.msrb.mxu1 %v4029_v63  ;;  %v827_v63 = vpack.c.b16 %v795_v53, %v795_v53  ;;  %v4127_v53 = vld [vmem:[%s4629_s10 + $0x460] sm:$0xff] }
  0x75   : > { %2500 = vmatpush.bf16.msrb.mxu2 %v4037_v0  ;;  %v826_v0 = vpack.c.b16 %v794_v56, %v794_v56  ;;  %v4118_v56 = vld [vmem:[%s4629_s10 + $0x418] sm:$0xff] }
  0x76   : > { %2513 = vmatpush.bf16.msrb.mxu3 %v4045_v1  ;;  %v828_v1 = vpack.c.b16 %v796_v57, %v796_v57  ;;  %v4126_v57 = vld [vmem:[%s4629_s10 + $0x458] sm:$0xff] }
  0x77   : > { %2475 = vmatpush.bf16.msrb.mxu0 %v4020_v2  ;;  %v4089_v2 = vld [vmem:[%s4629_s10 + $0x330] sm:$0xff] }
  0x78   : > { %2488 = vmatpush.bf16.msrb.mxu1 %v4028_v3  ;;  %v4097_v3 = vld [vmem:[%s4629_s10 + $0x370] sm:$0xff] }
  0x79   : > { %2501 = vmatpush.bf16.msrb.mxu2 %v4036_v4  ;;  %v4105_v4 = vld [vmem:[%s4629_s10 + $0x3b0] sm:$0xff] }
  0x7a   : > { %2514 = vmatpush.bf16.msrb.mxu3 %v4044_v5  ;;  %v4113_v5 = vld [vmem:[%s4629_s10 + $0x3f0] sm:$0xff] }
  0x7b   : > { %2476 = vmatpush.bf16.msrb.mxu0 %v4019_v8  ;;  %v4104_v8 = vld [vmem:[%s4629_s10 + $0x3a8] sm:$0xff] }
  0x7c   : > { %2489 = vmatpush.bf16.msrb.mxu1 %v4027_v9  ;;  %v4112_v9 = vld [vmem:[%s4629_s10 + $0x3e8] sm:$0xff] }
  0x7d   : > { %2502 = vmatpush.bf16.msrb.mxu2 %v4035_v12  ;;  %v4103_v12 = vld [vmem:[%s4629_s10 + $0x3a0] sm:$0xff] }
  0x7e   : > { %2515 = vmatpush.bf16.msrb.mxu3 %v4043_v13  ;;  %2477 = vmatmul.bf16.vlgmr.msrb.gmra.mxu0 %v821_v21  ;;  %v4111_v13 = vld [vmem:[%s4629_s10 + $0x3e0] sm:$0xff]  ;;  %v4109_v21 = vld [vmem:[%s4629_s10 + $0x3d0] sm:$0xff] }
  0x7f   : > { %2521 = vmatpush.bf16.msra.mxu0 %v4058_v16  ;;  %2490 = vmatmul.bf16.vlgmr.msrb.gmra.mxu1 %v822_v23  ;;  %v4102_v16 = vld [vmem:[%s4629_s10 + $0x398] sm:$0xff]  ;;  %v4092_v23 = vld [vmem:[%s4629_s10 + $0x348] sm:$0xff] }
  0x80   : > { %2534 = vmatpush.bf16.msra.mxu1 %v4066_v17  ;;  %2503 = vmatmul.bf16.vlgmr.msrb.gmra.mxu2 %v823_v20  ;;  %v4110_v17 = vld [vmem:[%s4629_s10 + $0x3d8] sm:$0xff]  ;;  %v4101_v20 = vld [vmem:[%s4629_s10 + $0x390] sm:$0xff] }
  0x81   : > { %2547 = vmatpush.bf16.msra.mxu2 %v4074_v18  ;;  %2516 = vmatmul.bf16.vlgmr.msrb.gmra.mxu3 %v824_v22  ;;  %v4085_v18 = vld [vmem:[%s4629_s10 + $0x310] sm:$0xff]  ;;  %v4084_v22 = vld [vmem:[%s4629_s10 + $0x308] sm:$0xff] }
  0x82   : > { %2560 = vmatpush.bf16.msra.mxu3 %v4082_v19  ;;  %v4093_v19 = vld [vmem:[%s4629_s10 + $0x350] sm:$0xff] }
  0x83   : > { %2522 = vmatpush.bf16.msra.mxu0 %v4057_v24  ;;  %v4100_v24 = vld [vmem:[%s4629_s10 + $0x388] sm:$0xff] }
  0x84   : > { %2535 = vmatpush.bf16.msra.mxu1 %v4065_v25  ;;  %v4108_v25 = vld [vmem:[%s4629_s10 + $0x3c8] sm:$0xff] }
  0x85   : > { %2548 = vmatpush.bf16.msra.mxu2 %v4073_v26  ;;  %v243_v26 = vld [vmem:[#allocation2 + $0x30] sm:$0xff] }
  0x86   : > { %2561 = vmatpush.bf16.msra.mxu3 %v4081_v27  ;;  %v244_v27 = vld [vmem:[#allocation2 + $0x38] sm:$0xff] }
  0x87   : > { %2523 = vmatpush.bf16.msra.mxu0 %v4056_v28  ;;  %v4083_v28 = vld [vmem:[%s4629_s10 + $0x300] sm:$0xff] }
  0x88   : > { %2536 = vmatpush.bf16.msra.mxu1 %v4064_v29  ;;  %v4091_v29 = vld [vmem:[%s4629_s10 + $0x340] sm:$0xff] }
  0x89   : > { %2549 = vmatpush.bf16.msra.mxu2 %v4072_v30  ;;  %v797_v30 = vunpack.c.l.b16 %v243_v26 }
  0x8a   : > { %2562 = vmatpush.bf16.msra.mxu3 %v4080_v31  ;;  %v799_v31 = vunpack.c.l.b16 %v244_v27 }
  0x8b   : > { %2524 = vmatpush.bf16.msra.mxu0 %v4055_v32  ;;  %v4099_v32 = vld [vmem:[%s4629_s10 + $0x380] sm:$0xff] }
  0x8c   : > { %2537 = vmatpush.bf16.msra.mxu1 %v4063_v33  ;;  %v4107_v33 = vld [vmem:[%s4629_s10 + $0x3c0] sm:$0xff] }
  0x8d   : > { %2550 = vmatpush.bf16.msra.mxu2 %v4071_v34  ;;  %v798_v34 = vunpack.c.h.b16 %v243_v26  ;;  %v4152_v26 = vld [vmem:[%s4629_s10 + $0x528] sm:$0xff] }
  0x8e   : > { %2563 = vmatpush.bf16.msra.mxu3 %v4079_v35  ;;  %v800_v35 = vunpack.c.h.b16 %v244_v27  ;;  %v4160_v27 = vld [vmem:[%s4629_s10 + $0x568] sm:$0xff] }
  0x8f   : > { %2525 = vmatpush.bf16.msra.mxu0 %v4054_v36  ;;  %v4122_v36 = vld [vmem:[%s4629_s10 + $0x438] sm:$0xff] }
  0x90   : > { %2538 = vmatpush.bf16.msra.mxu1 %v4062_v37  ;;  %v4130_v37 = vld [vmem:[%s4629_s10 + $0x478] sm:$0xff] }
  0x91   : > { %2551 = vmatpush.bf16.msra.mxu2 %v4070_v38  ;;  %v4138_v38 = vld [vmem:[%s4629_s10 + $0x4b8] sm:$0xff] }
  0x92   : > { %2564 = vmatpush.bf16.msra.mxu3 %v4078_v39  ;;  %v4146_v39 = vld [vmem:[%s4629_s10 + $0x4f8] sm:$0xff] }
  0x93   : > { %2526 = vmatpush.bf16.msra.mxu0 %v4053_v40  ;;  %v829_v40 = vpack.c.b16 %v797_v30, %v797_v30  ;;  %v4176_v30 = vld [vmem:[%s4629_s10 + $0x5e8] sm:$0xff] }
  0x94   : > { %2539 = vmatpush.bf16.msra.mxu1 %v4061_v41  ;;  %v831_v41 = vpack.c.b16 %v799_v31, %v799_v31 }
  0x95   : > { %2552 = vmatpush.bf16.msra.mxu2 %v4069_v42  ;;  %v830_v42 = vpack.c.b16 %v798_v34, %v798_v34 }
  0x96   : > { %2565 = vmatpush.bf16.msra.mxu3 %v4077_v43  ;;  %v832_v43 = vpack.c.b16 %v800_v35, %v800_v35 }
  0x97   : > { %2527 = vmatpush.bf16.msra.mxu0 %v4052_v44  ;;  %v4121_v44 = vld [vmem:[%s4629_s10 + $0x430] sm:$0xff] }
  0x98   : > { %2540 = vmatpush.bf16.msra.mxu1 %v4060_v45  ;;  %v4129_v45 = vld [vmem:[%s4629_s10 + $0x470] sm:$0xff] }
  0x99   : > { %2553 = vmatpush.bf16.msra.mxu2 %v4068_v46  ;;  %v4137_v46 = vld [vmem:[%s4629_s10 + $0x4b0] sm:$0xff] }
  0x9a   : > { %2566 = vmatpush.bf16.msra.mxu3 %v4076_v47  ;;  %v4145_v47 = vld [vmem:[%s4629_s10 + $0x4f0] sm:$0xff] }
  0x9b   : > { %2528 = vmatpush.bf16.msra.mxu0 %v4051_v50  ;;  %v4136_v50 = vld [vmem:[%s4629_s10 + $0x4a8] sm:$0xff] }
  0x9c   : > { %2541 = vmatpush.bf16.msra.mxu1 %v4059_v51  ;;  %v4144_v51 = vld [vmem:[%s4629_s10 + $0x4e8] sm:$0xff] }
  0x9d   : > { %2554 = vmatpush.bf16.msra.mxu2 %v4067_v54  ;;  %v4135_v54 = vld [vmem:[%s4629_s10 + $0x4a0] sm:$0xff] }
  0x9e   : > { %2567 = vmatpush.bf16.msra.mxu3 %v4075_v55  ;;  %2529 = vmatmul.bf16.vlgmr.msra.gmra.mxu0 %v825_v62  ;;  %v4143_v55 = vld [vmem:[%s4629_s10 + $0x4e0] sm:$0xff]  ;;  %v4133_v62 = vld [vmem:[%s4629_s10 + $0x490] sm:$0xff] }
  0x9f   : > { %2573 = vmatpush.bf16.msrb.mxu0 %v4090_v58  ;;  %2542 = vmatmul.bf16.vlgmr.msra.gmra.mxu1 %v826_v0  ;;  %v4134_v58 = vld [vmem:[%s4629_s10 + $0x498] sm:$0xff]  ;;  %v4116_v0 = vld [vmem:[%s4629_s10 + $0x408] sm:$0xff] }
  0xa0   : > { %2586 = vmatpush.bf16.msrb.mxu1 %v4098_v59  ;;  %2555 = vmatmul.bf16.vlgmr.msra.gmra.mxu2 %v827_v63  ;;  %v4142_v59 = vld [vmem:[%s4629_s10 + $0x4d8] sm:$0xff]  ;;  %v4141_v63 = vld [vmem:[%s4629_s10 + $0x4d0] sm:$0xff] }
  0xa1   : > { %2599 = vmatpush.bf16.msrb.mxu2 %v4106_v60  ;;  %2568 = vmatmul.bf16.vlgmr.msra.gmra.mxu3 %v828_v1  ;;  %v4117_v60 = vld [vmem:[%s4629_s10 + $0x410] sm:$0xff]  ;;  %v4124_v1 = vld [vmem:[%s4629_s10 + $0x448] sm:$0xff] }
  0xa2   : > { %2612 = vmatpush.bf16.msrb.mxu3 %v4114_v61  ;;  %v4125_v61 = vld [vmem:[%s4629_s10 + $0x450] sm:$0xff] }
  0xa3   : > { %2574 = vmatpush.bf16.msrb.mxu0 %v4089_v2  ;;  %v4132_v2 = vld [vmem:[%s4629_s10 + $0x488] sm:$0xff] }
  0xa4   : > { %2587 = vmatpush.bf16.msrb.mxu1 %v4097_v3  ;;  %v4140_v3 = vld [vmem:[%s4629_s10 + $0x4c8] sm:$0xff] }
  0xa5   : > { %2600 = vmatpush.bf16.msrb.mxu2 %v4105_v4  ;;  %v245_v4 = vld [vmem:[#allocation2 + $0x40] sm:$0xff] }
  0xa6   : > { %2613 = vmatpush.bf16.msrb.mxu3 %v4113_v5  ;;  %v246_v5 = vld [vmem:[#allocation2 + $0x48] sm:$0xff] }
  0xa7   : > { %2575 = vmatpush.bf16.msrb.mxu0 %v4088_v6  ;;  %v4115_v6 = vld [vmem:[%s4629_s10 + $0x400] sm:$0xff] }
  0xa8   : > { %2588 = vmatpush.bf16.msrb.mxu1 %v4096_v7  ;;  %v4123_v7 = vld [vmem:[%s4629_s10 + $0x440] sm:$0xff] }
  0xa9   : > { %2601 = vmatpush.bf16.msrb.mxu2 %v4104_v8  ;;  %v801_v8 = vunpack.c.l.b16 %v245_v4 }
  0xaa   : > { %2614 = vmatpush.bf16.msrb.mxu3 %v4112_v9  ;;  %v803_v9 = vunpack.c.l.b16 %v246_v5 }
  0xab   : > { %2576 = vmatpush.bf16.msrb.mxu0 %v4087_v10  ;;  %v4131_v10 = vld [vmem:[%s4629_s10 + $0x480] sm:$0xff] }
  0xac   : > { %2589 = vmatpush.bf16.msrb.mxu1 %v4095_v11  ;;  %v4139_v11 = vld [vmem:[%s4629_s10 + $0x4c0] sm:$0xff] }
  0xad   : > { %2602 = vmatpush.bf16.msrb.mxu2 %v4103_v12  ;;  %v802_v12 = vunpack.c.h.b16 %v245_v4 }
  0xae   : > { %2615 = vmatpush.bf16.msrb.mxu3 %v4111_v13  ;;  %v804_v13 = vunpack.c.h.b16 %v246_v5  ;;  %v4186_v5 = vld [vmem:[%s4629_s10 + $0x638] sm:$0xff] }
  0xaf   : > { %2577 = vmatpush.bf16.msrb.mxu0 %v4086_v14  ;;  %v4154_v14 = vld [vmem:[%s4629_s10 + $0x538] sm:$0xff] }
  0xb0   : > { %2590 = vmatpush.bf16.msrb.mxu1 %v4094_v15  ;;  %v4162_v15 = vld [vmem:[%s4629_s10 + $0x578] sm:$0xff] }
  0xb1   : > { %2603 = vmatpush.bf16.msrb.mxu2 %v4102_v16  ;;  %v4170_v16 = vld [vmem:[%s4629_s10 + $0x5b8] sm:$0xff] }
  0xb2   : > { %2616 = vmatpush.bf16.msrb.mxu3 %v4110_v17  ;;  %v4178_v17 = vld [vmem:[%s4629_s10 + $0x5f8] sm:$0xff] }
  0xb3   : > { %2578 = vmatpush.bf16.msrb.mxu0 %v4085_v18  ;;  %v833_v18 = vpack.c.b16 %v801_v8, %v801_v8  ;;  %v4210_v8 = vld [vmem:[%s4629_s10 + $0x6f8] sm:$0xff] }
  0xb4   : > { %2591 = vmatpush.bf16.msrb.mxu1 %v4093_v19  ;;  %v835_v19 = vpack.c.b16 %v803_v9, %v803_v9 }
  0xb5   : > { %2604 = vmatpush.bf16.msrb.mxu2 %v4101_v20  ;;  %v834_v20 = vpack.c.b16 %v802_v12, %v802_v12 }
  0xb6   : > { %2617 = vmatpush.bf16.msrb.mxu3 %v4109_v21  ;;  %v836_v21 = vpack.c.b16 %v804_v13, %v804_v13  ;;  %v4185_v13 = vld [vmem:[%s4629_s10 + $0x630] sm:$0xff] }
  0xb7   : > { %2579 = vmatpush.bf16.msrb.mxu0 %v4084_v22  ;;  %v4153_v22 = vld [vmem:[%s4629_s10 + $0x530] sm:$0xff] }
  0xb8   : > { %2592 = vmatpush.bf16.msrb.mxu1 %v4092_v23  ;;  %v4161_v23 = vld [vmem:[%s4629_s10 + $0x570] sm:$0xff] }
  0xb9   : > { %2605 = vmatpush.bf16.msrb.mxu2 %v4100_v24  ;;  %v4169_v24 = vld [vmem:[%s4629_s10 + $0x5b0] sm:$0xff] }
  0xba   : > { %2618 = vmatpush.bf16.msrb.mxu3 %v4108_v25  ;;  %v4177_v25 = vld [vmem:[%s4629_s10 + $0x5f0] sm:$0xff] }
  0xbb   : > { %2580 = vmatpush.bf16.msrb.mxu0 %v4083_v28  ;;  %v4308_v28 = vld [vmem:[%s209_s4] ss:$0 sm:$0xff] }
  0xbc   : > { %2593 = vmatpush.bf16.msrb.mxu1 %v4091_v29  ;;  %v4168_v29 = vld [vmem:[%s4629_s10 + $0x5a8] sm:$0xff] }
  0xbd   : > { %2606 = vmatpush.bf16.msrb.mxu2 %v4099_v32  ;;  %v4151_v32 = vld [vmem:[%s4629_s10 + $0x520] sm:$0xff] }
  0xbe   : > { %2619 = vmatpush.bf16.msrb.mxu3 %v4107_v33  ;;  %2581 = vmatmul.bf16.vlgmr.msrb.gmra.mxu0 %v829_v40  ;;  %v4159_v33 = vld [vmem:[%s4629_s10 + $0x560] sm:$0xff]  ;;  %v4158_v40 = vld [vmem:[%s4629_s10 + $0x558] sm:$0xff] }
  0xbf   : > { %2625 = vmatpush.bf16.msra.mxu0 %v4122_v36  ;;  %2594 = vmatmul.bf16.vlgmr.msrb.gmra.mxu1 %v830_v42  ;;  %v4167_v36 = vld [vmem:[%s4629_s10 + $0x5a0] sm:$0xff]  ;;  %v4174_v42 = vld [vmem:[%s4629_s10 + $0x5d8] sm:$0xff] }
  0xc0   : > { %2638 = vmatpush.bf16.msra.mxu1 %v4130_v37  ;;  %2607 = vmatmul.bf16.vlgmr.msrb.gmra.mxu2 %v831_v41  ;;  %v4175_v37 = vld [vmem:[%s4629_s10 + $0x5e0] sm:$0xff]  ;;  %v4166_v41 = vld [vmem:[%s4629_s10 + $0x598] sm:$0xff] }
  0xc1   : > { %2651 = vmatpush.bf16.msra.mxu2 %v4138_v38  ;;  %2620 = vmatmul.bf16.vlgmr.msrb.gmra.mxu3 %v832_v43 }
  0xc2   : > { %2664 = vmatpush.bf16.msra.mxu3 %v4146_v39  ;;  %v4150_v39 = vld [vmem:[%s4629_s10 + $0x518] sm:$0xff] }
  0xc3   : > { %2626 = vmatpush.bf16.msra.mxu0 %v4121_v44 }
  0xc4   : > { %2639 = vmatpush.bf16.msra.mxu1 %v4129_v45 }
  0xc5   : > { %2652 = vmatpush.bf16.msra.mxu2 %v4137_v46 }
  0xc6   : > { %2665 = vmatpush.bf16.msra.mxu3 %v4145_v47  ;;  %v4149_v47 = vld [vmem:[%s4629_s10 + $0x510] sm:$0xff] }
  0xc7   : > { %2627 = vmatpush.bf16.msra.mxu0 %v4120_v48  ;;  %v4157_v48 = vld [vmem:[%s4629_s10 + $0x550] sm:$0xff] }
  0xc8   : > { %2640 = vmatpush.bf16.msra.mxu1 %v4128_v49 }
  0xc9   : > { %2653 = vmatpush.bf16.msra.mxu2 %v4136_v50 }
  0xca   : > { %2666 = vmatpush.bf16.msra.mxu3 %v4144_v51  ;;  %v4165_v51 = vld [vmem:[%s4629_s10 + $0x590] sm:$0xff] }
  0xcb   : > { %2628 = vmatpush.bf16.msra.mxu0 %v4119_v52  ;;  %v4173_v52 = vld [vmem:[%s4629_s10 + $0x5d0] sm:$0xff] }
  0xcc   : > { %2641 = vmatpush.bf16.msra.mxu1 %v4127_v53  ;;  %v4148_v53 = vld [vmem:[%s4629_s10 + $0x508] sm:$0xff] }
  0xcd   : > { %2654 = vmatpush.bf16.msra.mxu2 %v4135_v54  ;;  %v4156_v54 = vld [vmem:[%s4629_s10 + $0x548] sm:$0xff] }
  0xce   : > { %2667 = vmatpush.bf16.msra.mxu3 %v4143_v55  ;;  %v4164_v55 = vld [vmem:[%s4629_s10 + $0x588] sm:$0xff] }
  0xcf   : > { %2629 = vmatpush.bf16.msra.mxu0 %v4118_v56  ;;  %v4172_v56 = vld [vmem:[%s4629_s10 + $0x5c8] sm:$0xff] }
  0xd0   : > { %2642 = vmatpush.bf16.msra.mxu1 %v4126_v57  ;;  %v247_v57 = vld [vmem:[#allocation2 + $0x50] sm:$0xff] }
  0xd1   : > { %2655 = vmatpush.bf16.msra.mxu2 %v4134_v58  ;;  %v248_v58 = vld [vmem:[#allocation2 + $0x58] sm:$0xff] }
  0xd2   : > { %2668 = vmatpush.bf16.msra.mxu3 %v4142_v59  ;;  %v808_v4 = vunpack.c.h.b16 %v248_v58 }
  0xd3   : > { %2630 = vmatpush.bf16.msra.mxu0 %v4117_v60 }
  0xd4   : > { %2643 = vmatpush.bf16.msra.mxu1 %v4125_v61  ;;  %v4147_v61 = vld [vmem:[%s4629_s10 + $0x500] sm:$0xff]  ;;  %v840_v12 = vpack.c.b16 %v808_v4, %v808_v4  ;;  %v4225_v4 = vld [vmem:[%s4629_s10 + $0x770] sm:$0xff] }
  0xd5   : > { %2656 = vmatpush.bf16.msra.mxu2 %v4133_v62  ;;  %v4155_v62 = vld [vmem:[%s4629_s10 + $0x540] sm:$0xff] }
  0xd6   : > { %2669 = vmatpush.bf16.msra.mxu3 %v4141_v63  ;;  %v805_v63 = vunpack.c.l.b16 %v247_v57 }
  0xd7   : > { %2631 = vmatpush.bf16.msra.mxu0 %v4116_v0  ;;  %v807_v0 = vunpack.c.l.b16 %v248_v58 }
  0xd8   : > { %2644 = vmatpush.bf16.msra.mxu1 %v4124_v1  ;;  %v4163_v1 = vld [vmem:[%s4629_s10 + $0x580] sm:$0xff]  ;;  %v837_v9 = vpack.c.b16 %v805_v63, %v805_v63 }
  0xd9   : > { %2657 = vmatpush.bf16.msra.mxu2 %v4132_v2  ;;  %v4171_v2 = vld [vmem:[%s4629_s10 + $0x5c0] sm:$0xff] }
  0xda   : > { %2670 = vmatpush.bf16.msra.mxu3 %v4140_v3  ;;  %v806_v3 = vunpack.c.h.b16 %v247_v57 }
  0xdb   : > { %2632 = vmatpush.bf16.msra.mxu0 %v4115_v6  ;;  %v2426_v31 = vpop.f32.mrf.mxu0  ;;  %v4194_v6 = vld [vmem:[%s4629_s10 + $0x678] sm:$0xff] }
  0xdc   : > { %2645 = vmatpush.bf16.msra.mxu1 %v4123_v7  ;;  %v2427_v34 = vadd.f32 %v4308_v28, %v2426_v31  ;;  %v2439_v35 = vpop.f32.mrf.mxu1  ;;  %v4202_v7 = vld [vmem:[%s4629_s10 + $0x6b8] sm:$0xff] }
  0xdd   : > { %2658 = vmatpush.bf16.msra.mxu2 %v4131_v10  ;;  %v839_v10 = vpack.c.b16 %v807_v0, %v807_v0  ;;  %v4198_v31 = vld [vmem:[%s4629_s10 + $0x698] sm:$0xff] }
  0xde   : > { %2671 = vmatpush.bf16.msra.mxu3 %v4139_v11  ;;  %2633 = vmatmul.bf16.vlgmr.msra.gmra.mxu0 %v833_v18  ;;  %v2440_v38 = vadd.f32 %v2439_v35, %v2427_v34  ;;  %v838_v11 = vpack.c.b16 %v806_v3, %v806_v3  ;;  %v4192_v18 = vld [vmem:[%s4629_s10 + $0x668] sm:$0xff]  ;;  %v4217_v3 = vld [vmem:[%s4629_s10 + $0x730] sm:$0xff] }
  0xdf   : > { %2677 = vmatpush.bf16.msrb.mxu0 %v4154_v14  ;;  %2646 = vmatmul.bf16.vlgmr.msra.gmra.mxu1 %v834_v20  ;;  %v4193_v14 = vld [vmem:[%s4629_s10 + $0x670] sm:$0xff]  ;;  %v4208_v20 = vld [vmem:[%s4629_s10 + $0x6e8] sm:$0xff] }
  0xe0   : > { %2690 = vmatpush.bf16.msrb.mxu1 %v4162_v15  ;;  %2659 = vmatmul.bf16.vlgmr.msra.gmra.mxu2 %v835_v19  ;;  %v4201_v15 = vld [vmem:[%s4629_s10 + $0x6b0] sm:$0xff]  ;;  %v4200_v19 = vld [vmem:[%s4629_s10 + $0x6a8] sm:$0xff] }
  0xe1   : > { %2703 = vmatpush.bf16.msrb.mxu2 %v4170_v16  ;;  %2672 = vmatmul.bf16.vlgmr.msra.gmra.mxu3 %v836_v21  ;;  %v4209_v16 = vld [vmem:[%s4629_s10 + $0x6f0] sm:$0xff] }
  0xe2   : > { %2716 = vmatpush.bf16.msrb.mxu3 %v4178_v17  ;;  %v4184_v17 = vld [vmem:[%s4629_s10 + $0x628] sm:$0xff] }
  0xe3   : > { %2678 = vmatpush.bf16.msrb.mxu0 %v4153_v22  ;;  %v2452_v43 = vpop.f32.mrf.mxu2  ;;  %v2428_v46 = vpop.f32.mrf.mxu0  ;;  %v4183_v22 = vld [vmem:[%s4629_s10 + $0x620] sm:$0xff] }
  0xe4   : > { %2691 = vmatpush.bf16.msrb.mxu1 %v4161_v23  ;;  %v2453_v44 = vadd.f32 %v2452_v43, %v2440_v38  ;;  %v2465_v45 = vpop.f32.mrf.mxu3  ;;  %v2441_v50 = vpop.f32.mrf.mxu1  ;;  %v4191_v23 = vld [vmem:[%s4629_s10 + $0x660] sm:$0xff]  ;;  %v4189_v38 = vld [vmem:[%s4629_s10 + $0x650] sm:$0xff]  ;;  %v4180_v43 = vld [vmem:[%s4629_s10 + $0x608] sm:$0xff] }
  0xe5   : > { %2704 = vmatpush.bf16.msrb.mxu2 %v4169_v24  ;;  %v4204_v46 = vld [vmem:[%s4629_s10 + $0x6c8] sm:$0xff] }
  0xe6   : > { %2717 = vmatpush.bf16.msrb.mxu3 %v4177_v25  ;;  %v4820_v49 = vadd.f32 %v2465_v45, %v2453_v44  ;;  %v4188_v44 = vld [vmem:[%s4629_s10 + $0x648] sm:$0xff] }
  0xe7   : > { %2679 = vmatpush.bf16.msrb.mxu0 %v4152_v26  ;;  %v4199_v26 = vld [vmem:[%s4629_s10 + $0x6a0] sm:$0xff]  ;;  %v4196_v45 = vld [vmem:[%s4629_s10 + $0x688] sm:$0xff] }
  0xe8   : > { %2692 = vmatpush.bf16.msrb.mxu1 %v4160_v27  ;;  %v4207_v27 = vld [vmem:[%s4629_s10 + $0x6e0] sm:$0xff] }
  0xe9   : > { %2705 = vmatpush.bf16.msrb.mxu2 %v4168_v29  ;;  %v4182_v29 = vld [vmem:[%s4629_s10 + $0x618] sm:$0xff] }
  0xea   : > { %2718 = vmatpush.bf16.msrb.mxu3 %v4176_v30  ;;  %v4190_v30 = vld [vmem:[%s4629_s10 + $0x658] sm:$0xff] }
  0xeb   : > { %2680 = vmatpush.bf16.msrb.mxu0 %v4151_v32  ;;  %v2454_v59 = vpop.f32.mrf.mxu2  ;;  %v4206_v32 = vld [vmem:[%s4629_s10 + $0x6d8] sm:$0xff] }
  0xec   : > { %2693 = vmatpush.bf16.msrb.mxu1 %v4159_v33  ;;  %v2467_v60 = vpop.f32.mrf.mxu3  ;;  %v4218_v59 = vld [vmem:[%s4629_s10 + $0x738] sm:$0xff] }
  0xed   : > { %2706 = vmatpush.bf16.msrb.mxu2 %v4167_v36  ;;  %v4226_v60 = vld [vmem:[%s4629_s10 + $0x778] sm:$0xff] }
  0xee   : > { %2719 = vmatpush.bf16.msrb.mxu3 %v4175_v37  ;;  %v4181_v37 = vld [vmem:[%s4629_s10 + $0x610] sm:$0xff] }
  0xef   : > { %2681 = vmatpush.bf16.msrb.mxu0 %v4150_v39 }
  0xf0   : > { %2694 = vmatpush.bf16.msrb.mxu1 %v4158_v40 }
  0xf1   : > { %2707 = vmatpush.bf16.msrb.mxu2 %v4166_v41  ;;  %v4197_v41 = vld [vmem:[%s4629_s10 + $0x690] sm:$0xff] }
  0xf2   : > { %2720 = vmatpush.bf16.msrb.mxu3 %v4174_v42  ;;  %v4205_v42 = vld [vmem:[%s4629_s10 + $0x6d0] sm:$0xff] }
  0xf3   : > { %2682 = vmatpush.bf16.msrb.mxu0 %v4149_v47  ;;  %v249_v47 = vld [vmem:[#allocation2 + $0x60] sm:$0xff] }
  0xf4   : > { %2695 = vmatpush.bf16.msrb.mxu1 %v4157_v48  ;;  %v250_v48 = vld [vmem:[#allocation2 + $0x68] sm:$0xff]  ;;  %v810_v57 = vunpack.c.h.b16 %v249_v47 }
  0xf5   : > { %2708 = vmatpush.bf16.msrb.mxu2 %v4165_v51  ;;  %v4179_v51 = vld [vmem:[%s4629_s10 + $0x600] sm:$0xff]  ;;  %v812_v58 = vunpack.c.h.b16 %v250_v48 }
  0xf6   : > { %2721 = vmatpush.bf16.msrb.mxu3 %v4173_v52  ;;  %v4187_v52 = vld [vmem:[%s4629_s10 + $0x640] sm:$0xff] }
  0xf7   : > { %2683 = vmatpush.bf16.msrb.mxu0 %v4148_v53  ;;  %v809_v53 = vunpack.c.l.b16 %v249_v47  ;;  %v4227_v47 = vld [vmem:[%s4629_s10 + $0x780] sm:$0xff] }
  0xf8   : > { %2696 = vmatpush.bf16.msrb.mxu1 %v4156_v54  ;;  %v811_v54 = vunpack.c.l.b16 %v250_v48  ;;  %v4235_v48 = vld [vmem:[%s4629_s10 + $0x7c0] sm:$0xff] }
  0xf9   : > { %2709 = vmatpush.bf16.msrb.mxu2 %v4164_v55  ;;  %v4195_v55 = vld [vmem:[%s4629_s10 + $0x680] sm:$0xff]  ;;  %v841_v63 = vpack.c.b16 %v809_v53, %v809_v53 }
  0xfa   : > { %2722 = vmatpush.bf16.msrb.mxu3 %v4172_v56  ;;  %v4203_v56 = vld [vmem:[%s4629_s10 + $0x6c0] sm:$0xff]  ;;  %v843_v0 = vpack.c.b16 %v811_v54, %v811_v54 }
  0xfb   : > { %2684 = vmatpush.bf16.msrb.mxu0 %v4147_v61  ;;  %v2478_v21 = vpop.f32.mrf.mxu0  ;;  %v4234_v61 = vld [vmem:[%s4629_s10 + $0x7b8] sm:$0xff] }
  0xfc   : > { %2697 = vmatpush.bf16.msrb.mxu1 %v4155_v62  ;;  %v2479_v24 = vadd.f32 %v2478_v21, %v4820_v49  ;;  %v2491_v25 = vpop.f32.mrf.mxu1  ;;  %v4242_v62 = vld [vmem:[%s4629_s10 + $0x7f8] sm:$0xff] }
  0xfd   : > { %2710 = vmatpush.bf16.msrb.mxu2 %v4163_v1  ;;  %v842_v1 = vpack.c.b16 %v810_v57, %v810_v57  ;;  %v4230_v21 = vld [vmem:[%s4629_s10 + $0x798] sm:$0xff] }
  0xfe   : > { %2723 = vmatpush.bf16.msrb.mxu3 %v4171_v2  ;;  %2685 = vmatmul.bf16.vlgmr.msrb.gmra.mxu0 %v837_v9  ;;  %v2492_v28 = vadd.f32 %v2491_v25, %v2479_v24  ;;  %v844_v2 = vpack.c.b16 %v812_v58, %v812_v58  ;;  %v4232_v9 = vld [vmem:[%s4629_s10 + $0x7a8] sm:$0xff] }
  0xff   : > { %2729 = vmatpush.bf16.msra.mxu0 %v4186_v5  ;;  %2698 = vmatmul.bf16.vlgmr.msrb.gmra.mxu1 %v838_v11  ;;  %v4233_v5 = vld [vmem:[%s4629_s10 + $0x7b0] sm:$0xff] }
 0x100   : > { %2742 = vmatpush.bf16.msra.mxu1 %v4194_v6  ;;  %2711 = vmatmul.bf16.vlgmr.msrb.gmra.mxu2 %v839_v10  ;;  %v4241_v6 = vld [vmem:[%s4629_s10 + $0x7f0] sm:$0xff]  ;;  %v4240_v10 = vld [vmem:[%s4629_s10 + $0x7e8] sm:$0xff] }
 0x101   : > { %2755 = vmatpush.bf16.msra.mxu2 %v4202_v7  ;;  %2724 = vmatmul.bf16.vlgmr.msrb.gmra.mxu3 %v840_v12  ;;  %v4216_v7 = vld [vmem:[%s4629_s10 + $0x728] sm:$0xff] }
 0x102   : > { %2768 = vmatpush.bf16.msra.mxu3 %v4210_v8  ;;  %v4224_v8 = vld [vmem:[%s4629_s10 + $0x768] sm:$0xff] }
 0x103   : > { %2730 = vmatpush.bf16.msra.mxu0 %v4185_v13  ;;  %v2504_v33 = vpop.f32.mrf.mxu2  ;;  %v2480_v36 = vpop.f32.mrf.mxu0  ;;  %v4215_v13 = vld [vmem:[%s4629_s10 + $0x720] sm:$0xff] }
 0x104   : > { %2743 = vmatpush.bf16.msra.mxu1 %v4193_v14  ;;  %v2505_v34 = vadd.f32 %v2504_v33, %v2492_v28  ;;  %v2517_v35 = vpop.f32.mrf.mxu3  ;;  %v2493_v40 = vpop.f32.mrf.mxu1  ;;  %v4223_v14 = vld [vmem:[%s4629_s10 + $0x760] sm:$0xff]  ;;  %v4213_v28 = vld [vmem:[%s4629_s10 + $0x710] sm:$0xff]  ;;  %v4212_v33 = vld [vmem:[%s4629_s10 + $0x708] sm:$0xff] }
 0x105   : > { %2756 = vmatpush.bf16.msra.mxu2 %v4201_v15  ;;  %v4228_v36 = vld [vmem:[%s4629_s10 + $0x788] sm:$0xff] }
 0x106   : > { %2769 = vmatpush.bf16.msra.mxu3 %v4209_v16  ;;  %v4855_v39 = vadd.f32 %v2517_v35, %v2505_v34  ;;  %v4231_v16 = vld [vmem:[%s4629_s10 + $0x7a0] sm:$0xff]  ;;  %v4220_v34 = vld [vmem:[%s4629_s10 + $0x748] sm:$0xff]  ;;  %v251_v35 = vld [vmem:[#allocation2 + $0x70] sm:$0xff] }
 0x107   : > { %2731 = vmatpush.bf16.msra.mxu0 %v4184_v17  ;;  %v4239_v17 = vld [vmem:[%s4629_s10 + $0x7e0] sm:$0xff] }
 0x108   : > { %2744 = vmatpush.bf16.msra.mxu1 %v4192_v18 }
 0x109   : > { %2757 = vmatpush.bf16.msra.mxu2 %v4200_v19  ;;  %v4214_v19 = vld [vmem:[%s4629_s10 + $0x718] sm:$0xff] }
 0x10a   : > { %2770 = vmatpush.bf16.msra.mxu3 %v4208_v20  ;;  %v4222_v20 = vld [vmem:[%s4629_s10 + $0x758] sm:$0xff] }
 0x10b   : > { %2732 = vmatpush.bf16.msra.mxu0 %v4183_v22  ;;  %v2506_v49 = vpop.f32.mrf.mxu2  ;;  %v4238_v22 = vld [vmem:[%s4629_s10 + $0x7d8] sm:$0xff] }
 0x10c   : > { %2745 = vmatpush.bf16.msra.mxu1 %v4191_v23  ;;  %v2519_v50 = vpop.f32.mrf.mxu3 }
 0x10d   : > { %2758 = vmatpush.bf16.msra.mxu2 %v4199_v26 }
 0x10e   : > { %2771 = vmatpush.bf16.msra.mxu3 %v4207_v27 }
 0x10f   : > { %2733 = vmatpush.bf16.msra.mxu0 %v4182_v29  ;;  %v4221_v29 = vld [vmem:[%s4629_s10 + $0x750] sm:$0xff] }
 0x110   : > { %2746 = vmatpush.bf16.msra.mxu1 %v4190_v30 }
 0x111   : > { %2759 = vmatpush.bf16.msra.mxu2 %v4198_v31  ;;  %v4229_v31 = vld [vmem:[%s4629_s10 + $0x790] sm:$0xff] }
 0x112   : > { %2772 = vmatpush.bf16.msra.mxu3 %v4206_v32  ;;  %v4237_v32 = vld [vmem:[%s4629_s10 + $0x7d0] sm:$0xff] }
 0x113   : > { %2734 = vmatpush.bf16.msra.mxu0 %v4181_v37  ;;  %v4236_v37 = vld [vmem:[%s4629_s10 + $0x7c8] sm:$0xff] }
 0x114   : > { %2747 = vmatpush.bf16.msra.mxu1 %v4189_v38  ;;  %v252_v38 = vld [vmem:[#allocation2 + $0x78] sm:$0xff] }
 0x115   : > { %2760 = vmatpush.bf16.msra.mxu2 %v4197_v41  ;;  %v813_v41 = vunpack.c.l.b16 %v251_v35 }
 0x116   : > { %2773 = vmatpush.bf16.msra.mxu3 %v4205_v42  ;;  %v814_v42 = vunpack.c.h.b16 %v251_v35 }
 0x117   : > { %2735 = vmatpush.bf16.msra.mxu0 %v4180_v43  ;;  %v4211_v43 = vld [vmem:[%s4629_s10 + $0x700] sm:$0xff]  ;;  %v845_v49 = vpack.c.b16 %v813_v41, %v813_v41 }
 0x118   : > { %2748 = vmatpush.bf16.msra.mxu1 %v4188_v44  ;;  %v4219_v44 = vld [vmem:[%s4629_s10 + $0x740] sm:$0xff]  ;;  %v846_v50 = vpack.c.b16 %v814_v42, %v814_v42 }
 0x119   : > { %2761 = vmatpush.bf16.msra.mxu2 %v4196_v45  ;;  %v815_v45 = vunpack.c.l.b16 %v252_v38 }
 0x11a   : > { %2774 = vmatpush.bf16.msra.mxu3 %v4204_v46  ;;  %v816_v46 = vunpack.c.h.b16 %v252_v38 }
 0x11b   : > { %2736 = vmatpush.bf16.msra.mxu0 %v4179_v51  ;;  %v2530_v11 = vpop.f32.mrf.mxu0  ;;  %v847_v51 = vpack.c.b16 %v815_v45, %v815_v45 }
 0x11c   : > { %2749 = vmatpush.bf16.msra.mxu1 %v4187_v52  ;;  %v2531_v12 = vadd.f32 %v2530_v11, %v4855_v39  ;;  %v2543_v15 = vpop.f32.mrf.mxu1  ;;  %v848_v52 = vpack.c.b16 %v816_v46, %v816_v46 }
 0x11d   : > { %2762 = vmatpush.bf16.msra.mxu2 %v4195_v55 }
 0x11e   : > { %2775 = vmatpush.bf16.msra.mxu3 %v4203_v56  ;;  %2737 = vmatmul.bf16.vlgmr.msra.gmra.mxu0 %v841_v63  ;;  %v2544_v18 = vadd.f32 %v2543_v15, %v2531_v12 }
 0x11f   : > { %2781 = vmatpush.bf16.msrb.mxu0 %v4218_v59  ;;  %2750 = vmatmul.bf16.vlgmr.msra.gmra.mxu1 %v842_v1 }
 0x120   : > { %2794 = vmatpush.bf16.msrb.mxu1 %v4226_v60  ;;  %2763 = vmatmul.bf16.vlgmr.msra.gmra.mxu2 %v843_v0 }
 0x121   : > { %2807 = vmatpush.bf16.msrb.mxu2 %v4234_v61  ;;  %2776 = vmatmul.bf16.vlgmr.msra.gmra.mxu3 %v844_v2 }
 0x122   : > { %2820 = vmatpush.bf16.msrb.mxu3 %v4242_v62 }
 0x123   : > { %2782 = vmatpush.bf16.msrb.mxu0 %v4217_v3  ;;  %v2556_v23 = vpop.f32.mrf.mxu2  ;;  %v2532_v26 = vpop.f32.mrf.mxu0 }
 0x124   : > { %2795 = vmatpush.bf16.msrb.mxu1 %v4225_v4  ;;  %v2557_v24 = vadd.f32 %v2556_v23, %v2544_v18  ;;  %v2569_v25 = vpop.f32.mrf.mxu3  ;;  %v2545_v30 = vpop.f32.mrf.mxu1 }
 0x125   : > { %2808 = vmatpush.bf16.msrb.mxu2 %v4233_v5 }
 0x126   : > { %2821 = vmatpush.bf16.msrb.mxu3 %v4241_v6  ;;  %v2570_v27 = vadd.f32 %v2569_v25, %v2557_v24 }
 0x127   : > { %2783 = vmatpush.bf16.msrb.mxu0 %v4216_v7 }
 0x128   : > { %2796 = vmatpush.bf16.msrb.mxu1 %v4224_v8 }
 0x129   : > { %2809 = vmatpush.bf16.msrb.mxu2 %v4232_v9 }
 0x12a   : > { %2822 = vmatpush.bf16.msrb.mxu3 %v4240_v10 }
 0x12b   : > { %2784 = vmatpush.bf16.msrb.mxu0 %v4215_v13  ;;  %v2558_v39 = vpop.f32.mrf.mxu2 }
 0x12c   : > { %2797 = vmatpush.bf16.msrb.mxu1 %v4223_v14  ;;  %v2571_v40 = vpop.f32.mrf.mxu3 }
 0x12d   : > { %2810 = vmatpush.bf16.msrb.mxu2 %v4231_v16 }
 0x12e   : > { %2823 = vmatpush.bf16.msrb.mxu3 %v4239_v17 }
 0x12f   : > { %2785 = vmatpush.bf16.msrb.mxu0 %v4214_v19 }
 0x130   : > { %2798 = vmatpush.bf16.msrb.mxu1 %v4222_v20 }
 0x131   : > { %2811 = vmatpush.bf16.msrb.mxu2 %v4230_v21 }
 0x132   : > { %2824 = vmatpush.bf16.msrb.mxu3 %v4238_v22 }
 0x133   : > { %2786 = vmatpush.bf16.msrb.mxu0 %v4213_v28 }
 0x134   : > { %2799 = vmatpush.bf16.msrb.mxu1 %v4221_v29 }
 0x135   : > { %2812 = vmatpush.bf16.msrb.mxu2 %v4229_v31 }
 0x136   : > { %2825 = vmatpush.bf16.msrb.mxu3 %v4237_v32 }
 0x137   : > { %2787 = vmatpush.bf16.msrb.mxu0 %v4212_v33 }
 0x138   : > { %2800 = vmatpush.bf16.msrb.mxu1 %v4220_v34 }
 0x139   : > { %2813 = vmatpush.bf16.msrb.mxu2 %v4228_v36 }
 0x13a   : > { %2826 = vmatpush.bf16.msrb.mxu3 %v4236_v37 }
 0x13b   : > { %2788 = vmatpush.bf16.msrb.mxu0 %v4211_v43  ;;  %v2582_v53 = vpop.f32.mrf.mxu0 }
 0x13c   : > { %2801 = vmatpush.bf16.msrb.mxu1 %v4219_v44  ;;  %v2583_v54 = vadd.f32 %v2582_v53, %v2570_v27  ;;  %v2595_v55 = vpop.f32.mrf.mxu1 }
 0x13d   : > { %2814 = vmatpush.bf16.msrb.mxu2 %v4227_v47 }
 0x13e   : > { %2827 = vmatpush.bf16.msrb.mxu3 %v4235_v48  ;;  %2789 = vmatmul.bf16.vlgmr.msrb.gmra.mxu0 %v845_v49  ;;  %v2596_v56 = vadd.f32 %v2595_v55, %v2583_v54 }
 0x13f   : > { %2802 = vmatmul.bf16.vlgmr.msrb.gmra.mxu1 %v846_v50 }
 0x140   : > { %2815 = vmatmul.bf16.vlgmr.msrb.gmra.mxu2 %v847_v51 }
 0x141   : > { %2828 = vmatmul.bf16.vlgmr.msrb.gmra.mxu3 %v848_v52 }
 0x143   : > { %v2608_v57 = vpop.f32.mrf.mxu2  ;;  %v2584_v60 = vpop.f32.mrf.mxu0 }
 0x144   : > { %v2609_v58 = vadd.f32 %v2608_v57, %v2596_v56  ;;  %v2621_v59 = vpop.f32.mrf.mxu3  ;;  %v2597_v62 = vpop.f32.mrf.mxu1 }
 0x146   : > { %v2622_v61 = vadd.f32 %v2621_v59, %v2609_v58 }
 0x14b   : > { %v2610_v63 = vpop.f32.mrf.mxu2 }
 0x14c   : > { %v2623_v0 = vpop.f32.mrf.mxu3 }
 0x15b   : > { %v2634_v1 = vpop.f32.mrf.mxu0 }
 0x15c   : > { %v2635_v2 = vadd.f32 %v2634_v1, %v2622_v61  ;;  %v2647_v3 = vpop.f32.mrf.mxu1 }
 0x15e   : > { %v2648_v4 = vadd.f32 %v2647_v3, %v2635_v2 }
 0x163   : > { %v2660_v5 = vpop.f32.mrf.mxu2  ;;  %v2636_v8 = vpop.f32.mrf.mxu0 }
 0x164   : > { %v2661_v6 = vadd.f32 %v2660_v5, %v2648_v4  ;;  %v2673_v7 = vpop.f32.mrf.mxu3  ;;  %v2649_v10 = vpop.f32.mrf.mxu1 }
 0x166   : > { %v2674_v9 = vadd.f32 %v2673_v7, %v2661_v6 }
 0x16b   : > { %v2662_v11 = vpop.f32.mrf.mxu2 }
 0x16c   : > { %v2675_v12 = vpop.f32.mrf.mxu3 }
 0x17b   : > { %v2686_v13 = vpop.f32.mrf.mxu0 }
 0x17c   : > { %v2699_v14 = vpop.f32.mrf.mxu1  ;;  %v2687_v24 = vadd.f32 %v2686_v13, %v2674_v9 }
 0x17e   : > { %v2700_v28 = vadd.f32 %v2699_v14, %v2687_v24 }
 0x183   : > { %v2712_v15 = vpop.f32.mrf.mxu2  ;;  %v2688_v17 = vpop.f32.mrf.mxu0 }
 0x184   : > { %v2725_v16 = vpop.f32.mrf.mxu3  ;;  %v2701_v18 = vpop.f32.mrf.mxu1  ;;  %v2713_v29 = vadd.f32 %v2712_v15, %v2700_v28 }
 0x186   : > { %v2726_v32 = vadd.f32 %v2725_v16, %v2713_v29 }
 0x18b   : > { %v2714_v19 = vpop.f32.mrf.mxu2 }
 0x18c   : > { %v2727_v20 = vpop.f32.mrf.mxu3 }
 0x19b   : > { %v2738_v21 = vpop.f32.mrf.mxu0 }
 0x19c   : > { %v2751_v22 = vpop.f32.mrf.mxu1  ;;  %v2739_v33 = vadd.f32 %v2738_v21, %v2726_v32 }
 0x19e   : > { %v2752_v34 = vadd.f32 %v2751_v22, %v2739_v33 }
 0x1a3   : > { %v2764_v23 = vpop.f32.mrf.mxu2  ;;  %v2740_v26 = vpop.f32.mrf.mxu0 }
 0x1a4   : > { %v2777_v25 = vpop.f32.mrf.mxu3  ;;  %v2753_v27 = vpop.f32.mrf.mxu1  ;;  %v2765_v35 = vadd.f32 %v2764_v23, %v2752_v34 }
 0x1a6   : > { %v2778_v36 = vadd.f32 %v2777_v25, %v2765_v35 }
 0x1ab   : > { %v2766_v30 = vpop.f32.mrf.mxu2 }
 0x1ac   : > { %v2779_v31 = vpop.f32.mrf.mxu3 }
 0x1bb   : > { %v2790_v37 = vpop.f32.mrf.mxu0 }
 0x1bc   : > { %v2803_v38 = vpop.f32.mrf.mxu1  ;;  %v2791_v39 = vadd.f32 %v2790_v37, %v2778_v36 }
 0x1be   : > { %v2804_v40 = vadd.f32 %v2803_v38, %v2791_v39 }
 0x1c3   : > { %v2816_v41 = vpop.f32.mrf.mxu2  ;;  %v2792_v44 = vpop.f32.mrf.mxu0 }
 0x1c4   : > { %v2829_v42 = vpop.f32.mrf.mxu3  ;;  %v2817_v43 = vadd.f32 %v2816_v41, %v2804_v40  ;;  %v2805_v45 = vpop.f32.mrf.mxu1 }
 0x1c6   : > { %v2830_v46 = vadd.f32 %v2829_v42, %v2817_v43 }
 0x1c8   : > { %v2833_v47 = vmax.f32 %v2830_v46, 0.0 }
 0x1ca   : > { %2834 = vst [vmem:[%s236_s20] sm:$0xff] %v2833_v47 }
 0x1cb   : > { %v2818_v48 = vpop.f32.mrf.mxu2 }
 0x1cc   : > { %v2831_v49 = vpop.f32.mrf.mxu3 }
 0x1cd   : > { %4426 = shalt.err (!%p4423_p7)
}
 0x1ce   : > { %4251 = dma.vmem_to_hbm [thread:$0]  (%p4580_p11), %s2849_s23, 128, %s2851_s27, %s2836_s22  }
 0x1cf PF: > { %s2862_s29 = sand.u32 1, %s4457_s12   ;;  %p4946_p9 = scmp.ge.s32.totalorder %s4469_s15, 2 }
 0x1d0   : > { %s2863_s10 = scalar_lea.sflag [#allocation4], %s2862_s29 }
 0x1d1   : > { %p4265_p13 = pnand %p4946_p9, %p4584_p12 }
 0x1d3   : > { %p4266_p0 = pneg %p4265_p13 }
 0x1d5   : > { %4452 = dma.done.wait (%p4266_p0), %s2863_s10, 128  }
 0x1d6   : > { %4454 = vsyncadd (%p4266_p0), %s2863_s10, 4294967168  ;;  %p17_p8 = scmp.ge.s32.totalorder %s4516_s16, 4   ;;  %s4947_s12 = smov %s4461_s13 }
 0x1d7   : > { %s4948_s13 = smov %s4465_s14  ;;  %s4949_s14 = smov %s4527_s19 }
 0x1d8   : > { %s4950_s15 = smov %s4516_s16  ;;  %19 = sbr.rel (!%p17_p8) target bundleno = 6 (0x6), region = 93 }
 0x1dd   :  { %2869 = vsyncpa [#allocation3], 1 }
 0x1de   :  { %2871 = vsyncpa [#allocation3 + $0x1], 1 }
 0x1df   :  { %2872 = vsyncpa [#allocation6], 1 }
 0x1e0   :  { %2874 = vsyncpa [#allocation6 + $0x1], 1 }
 0x1e1   :  { %2875 = vsyncpa [#allocation4], 1 }
 0x1e2   :  { %2877 = vsyncpa [#allocation4 + $0x1], 1 }

</bundles_post_ra>
